<compile_context>
chip_gen: v7x
topology: tpu7x:2x2x1
jax: 0.10.0
libtpu: 0.0.40
codegen_flags: <defaults>
</compile_context>

<pallas_src>
import jax
import jax.numpy as jnp
from jax.experimental import pallas as pl
from jax.experimental.pallas import tpu as pltpu


def _round_up(n, m):
    return ((n + m - 1) // m) * m


def _policy_kernel(x_ref, w1_ref, b1_ref, w2_ref, b2_ref, out_ref):
    # hidden = relu(x @ W1 + b1): bf16 MXU matmul, f32 accumulate, f32 bias/ReLU (VPU).
    x = x_ref[...].astype(jnp.bfloat16)
    h = jnp.dot(x, w1_ref[...], preferred_element_type=jnp.float32) + b1_ref[...]
    h = jnp.maximum(h, 0.0)

    # logits = h @ W2 + b2: bf16 MXU matmul, f32 accumulate, f32 bias.
    logits = (jnp.dot(h.astype(jnp.bfloat16), w2_ref[...],
                      preferred_element_type=jnp.float32) + b2_ref[...])

    # softmax over the action axis, entirely in f32; exact division for true normalization.
    m = jnp.max(logits, axis=-1, keepdims=True)
    e = jnp.exp(logits - m)
    denom = jnp.sum(e, axis=-1, keepdims=True)
    out_ref[...] = (e / denom).astype(out_ref.dtype)


def policy_forward(x, w1, b1, w2, b2, *, block_b=2048):
    """x: [B, obs], w1: [obs, H], b1: [1, H], w2: [H, A], b2: [1, A] -> probs [B, A] (f32)."""
    B, obs = x.shape
    hid = w1.shape[1]
    A = w2.shape[1]

    # Grid-resident weights: cast to bf16 once at the boundary (MXU-native, half the VMEM).
    x = x.astype(jnp.float32)
    w1 = w1.astype(jnp.bfloat16)
    w2 = w2.astype(jnp.bfloat16)
    b1 = b1.astype(jnp.float32)
    b2 = b2.astype(jnp.float32)

    # Balanced row tiles: prefer >= 2 tiles (megacore sharding on v7x) but never fewer than
    # 8 rows per tile; round each tile up to a multiple of 8 sublanes.
    max_tiles_by_rows = pl.cdiv(B, 8)
    want_tiles = max(2, pl.cdiv(B, block_b))
    num_tiles = min(want_tiles, max_tiles_by_rows)
    TB = _round_up(pl.cdiv(B, num_tiles), 8)
    num_tiles = pl.cdiv(B, TB)
    B_pad = num_tiles * TB
    if B_pad != B:
        x = jnp.pad(x, ((0, B_pad - B), (0, 0)))  # zero rows are safe; sliced off below

    grid = (num_tiles,)

    out = pl.pallas_call(
        _policy_kernel,
        out_shape=jax.ShapeDtypeStruct((B_pad, A), jnp.float32),
        grid=grid,
        in_specs=[
            pl.BlockSpec((TB, obs), lambda i: (i, 0)),      # streamed activations
            pl.BlockSpec((obs, hid), lambda i: (0, 0)),     # resident weights / biases
            pl.BlockSpec((1, hid), lambda i: (0, 0)),
            pl.BlockSpec((hid, A), lambda i: (0, 0)),
            pl.BlockSpec((1, A), lambda i: (0, 0)),
        ],
        # Output block last dim == full action dim (satisfies the (8,128) rule); unpadded
        # f32 writeback is 16x less HBM traffic than a lane-padded layout at A=8.
        out_specs=pl.BlockSpec((TB, A), lambda i: (i, 0)),
        compiler_params=pltpu.CompilerParams(
            dimension_semantics=("parallel",),
        ),
    )(x, w1, b1, w2, b2)

    return out[:B, :]


def init_params(key, obs_dim, hidden_dim, action_dim):
    """Deterministic init mimicking nn.Linear's default U(-1/sqrt(fan_in), 1/sqrt(fan_in))."""
    k1, k2, k3, k4 = jax.random.split(key, 4)
    bound1 = 1.0 / (obs_dim ** 0.5)
    bound2 = 1.0 / (hidden_dim ** 0.5)
    w1 = jax.random.uniform(k1, (obs_dim, hidden_dim), jnp.float32, -bound1, bound1)
    b1 = jax.random.uniform(k2, (1, hidden_dim), jnp.float32, -bound1, bound1)
    w2 = jax.random.uniform(k3, (hidden_dim, action_dim), jnp.float32, -bound2, bound2)
    b2 = jax.random.uniform(k4, (1, action_dim), jnp.float32, -bound2, bound2)
    return w1, b1, w2, b2


def reference_forward(x, w1, b1, w2, b2):
    h = jnp.maximum(x @ w1 + b1, 0.0)
    logits = h @ w2 + b2
    return jax.nn.softmax(logits, axis=1)


if __name__ == "__main__":
    # TODO(synk): the Adam optimizer is training-time state with no forward-pass Pallas equivalent.
    OBS, HID, ACT = 16, 128, 8

    key = jax.random.PRNGKey(0)
    kx, kp, kx2 = jax.random.split(key, 3)
    w1, b1, w2, b2 = init_params(kp, OBS, HID, ACT)

    # Case 1: tiny batch (single grid step, padded to 8 rows).
    B = 8
    x = jax.random.normal(kx, (B, OBS), jnp.float32)
    out = jax.block_until_ready(policy_forward(x, w1, b1, w2, b2))
    ref = reference_forward(x, w1, b1, w2, b2)
    assert out.shape == (B, ACT)
    # Exact division -> rows sum to 1 up to f32 rounding.
    assert jnp.allclose(jnp.sum(out, axis=1), 1.0, atol=1e-4)
    # bf16 matmul inputs (f32 accumulation / softmax) -> slightly relaxed vs the f32 reference.
    assert jnp.allclose(out, ref, atol=2e-2, rtol=2e-2)

    # Case 2: ragged batch exercising the multi-step grid + balanced-tile padding path.
    B2 = 40
    x2 = jax.random.normal(kx2, (B2, OBS), jnp.float32)
    out2 = jax.block_until_ready(policy_forward(x2, w1, b1, w2, b2, block_b=16))
    ref2 = reference_forward(x2, w1, b1, w2, b2)
    assert out2.shape == (B2, ACT)
    assert jnp.allclose(jnp.sum(out2, axis=1), 1.0, atol=1e-4)
    assert jnp.allclose(out2, ref2, atol=2e-2, rtol=2e-2)

    # Case 3: default block_b path (should split into >=2 balanced tiles for megacore).
    out3 = jax.block_until_ready(policy_forward(x2, w1, b1, w2, b2))
    assert out3.shape == (B2, ACT)
    assert jnp.allclose(out3, ref2, atol=2e-2, rtol=2e-2)

    print("KERNEL_OK")
</pallas_src>

<mosaic_0001>
module attributes {stable_mosaic.version = 11 : i64} {
  func.func @_policy_kernel(%arg0: i32, %arg1: memref<8x16xf32, #tpu.memory_space<vmem>>, %arg2: memref<16x128xbf16, #tpu.memory_space<vmem>>, %arg3: memref<1x128xf32, #tpu.memory_space<vmem>>, %arg4: memref<128x8xbf16, #tpu.memory_space<vmem>>, %arg5: memref<1x8xf32, #tpu.memory_space<vmem>>, %arg6: memref<8x8xf32, #tpu.memory_space<vmem>>) attributes {dimension_semantics = [#tpu.dimension_semantics<parallel>], iteration_bounds = array<i64: 1>, scalar_prefetch = 0 : i64, scratch_operands = 0 : i64, tpu.core_type = #tpu.core_type<tc>, window_params = [{transform_indices = @transform_0, window_bounds = array<i64: 8, 16>}, {pipeline_mode = #tpu.pipeline_mode<synchronous>, transform_indices = @transform_1, window_bounds = array<i64: 16, 128>}, {pipeline_mode = #tpu.pipeline_mode<synchronous>, transform_indices = @transform_2, window_bounds = array<i64: 1, 128>}, {pipeline_mode = #tpu.pipeline_mode<synchronous>, transform_indices = @transform_3, window_bounds = array<i64: 128, 8>}, {pipeline_mode = #tpu.pipeline_mode<synchronous>, transform_indices = @transform_4, window_bounds = array<i64: 1, 8>}, {transform_indices = @transform_5, window_bounds = array<i64: 8, 8>}]} {
    %c0 = arith.constant 0 : index
    %c0_0 = arith.constant 0 : index
    %0 = vector.load %arg1[%c0, %c0_0] : memref<8x16xf32, #tpu.memory_space<vmem>>, vector<8x16xf32>
    %1 = arith.truncf %0 : vector<8x16xf32> to vector<8x16xbf16>
    %c0_1 = arith.constant 0 : index
    %c0_2 = arith.constant 0 : index
    %2 = vector.load %arg2[%c0_1, %c0_2] : memref<16x128xbf16, #tpu.memory_space<vmem>>, vector<16x128xbf16>
    %cst = arith.constant dense<0.000000e+00> : vector<8x128xf32>
    %3 = tpu.matmul %1, %2, %cst {dimension_numbers = #tpu.dot_dimension_numbers<[1], [0], [0], [1], [0, 0, 1, 1], [], []>} : vector<8x16xbf16>, vector<16x128xbf16>, vector<8x128xf32> -> vector<8x128xf32>
    %c0_3 = arith.constant 0 : index
    %c0_4 = arith.constant 0 : index
    %4 = vector.load %arg3[%c0_3, %c0_4] : memref<1x128xf32, #tpu.memory_space<vmem>>, vector<1x128xf32>
    %5 = vector.broadcast %4 : vector<1x128xf32> to vector<8x128xf32>
    %6 = arith.addf %3, %5 : vector<8x128xf32>
    %cst_5 = arith.constant 0.000000e+00 : f32
    %7 = vector.broadcast %cst_5 : f32 to vector<8x128xf32>
    %8 = arith.maximumf %6, %7 : vector<8x128xf32>
    %9 = arith.truncf %8 : vector<8x128xf32> to vector<8x128xbf16>
    %c0_6 = arith.constant 0 : index
    %c0_7 = arith.constant 0 : index
    %10 = vector.load %arg4[%c0_6, %c0_7] : memref<128x8xbf16, #tpu.memory_space<vmem>>, vector<128x8xbf16>
    %cst_8 = arith.constant dense<0.000000e+00> : vector<8x8xf32>
    %11 = tpu.matmul %9, %10, %cst_8 {dimension_numbers = #tpu.dot_dimension_numbers<[1], [0], [0], [1], [0, 0, 1, 1], [], []>} : vector<8x128xbf16>, vector<128x8xbf16>, vector<8x8xf32> -> vector<8x8xf32>
    %c0_9 = arith.constant 0 : index
    %c0_10 = arith.constant 0 : index
    %12 = vector.load %arg5[%c0_9, %c0_10] : memref<1x8xf32, #tpu.memory_space<vmem>>, vector<1x8xf32>
    %13 = vector.broadcast %12 : vector<1x8xf32> to vector<8x8xf32>
    %14 = arith.addf %11, %13 : vector<8x8xf32>
    %cst_11 = arith.constant dense<0xFF800000> : vector<8xf32>
    %15 = vector.multi_reduction <maximumf>, %14, %cst_11 [1] : vector<8x8xf32> to vector<8xf32>
    %16 = vector.shape_cast %15 : vector<8xf32> to vector<8x1xf32>
    %17 = vector.broadcast %16 : vector<8x1xf32> to vector<8x8xf32>
    %18 = arith.subf %14, %17 : vector<8x8xf32>
    %19 = math.exp %18 : vector<8x8xf32>
    %cst_12 = arith.constant dense<0.000000e+00> : vector<8xf32>
    %20 = vector.multi_reduction <add>, %19, %cst_12 [1] : vector<8x8xf32> to vector<8xf32>
    %21 = vector.shape_cast %20 : vector<8xf32> to vector<8x1xf32>
    %22 = vector.broadcast %21 : vector<8x1xf32> to vector<8x8xf32>
    %23 = arith.divf %19, %22 : vector<8x8xf32>
    %c0_13 = arith.constant 0 : index
    %c0_14 = arith.constant 0 : index
    %24 = vector.load %arg6[%c0_13, %c0_14] : memref<8x8xf32, #tpu.memory_space<vmem>>, vector<8x8xf32>
    tpu.vector_store %arg6[%c0_13, %c0_14], %23 {strides = array<i32>} : memref<8x8xf32, #tpu.memory_space<vmem>>, vector<8x8xf32>,
    return
  }
  func.func @transform_0(%arg0: i32) -> (i32, i32) {
    %c0_i32 = arith.constant 0 : i32
    %c0_i32_0 = arith.constant 0 : i32
    return %arg0, %c0_i32 : i32, i32
  }
  func.func @transform_1(%arg0: i32) -> (i32, i32) {
    %c0_i32 = arith.constant 0 : i32
    %c0_i32_0 = arith.constant 0 : i32
    %c0_i32_1 = arith.constant 0 : i32
    return %c0_i32, %c0_i32_0 : i32, i32
  }
  func.func @transform_2(%arg0: i32) -> (i32, i32) {
    %c0_i32 = arith.constant 0 : i32
    %c0_i32_0 = arith.constant 0 : i32
    %c0_i32_1 = arith.constant 0 : i32
    return %c0_i32, %c0_i32_0 : i32, i32
  }
  func.func @transform_3(%arg0: i32) -> (i32, i32) {
    %c0_i32 = arith.constant 0 : i32
    %c0_i32_0 = arith.constant 0 : i32
    %c0_i32_1 = arith.constant 0 : i32
    return %c0_i32, %c0_i32_0 : i32, i32
  }
  func.func @transform_4(%arg0: i32) -> (i32, i32) {
    %c0_i32 = arith.constant 0 : i32
    %c0_i32_0 = arith.constant 0 : i32
    %c0_i32_1 = arith.constant 0 : i32
    return %c0_i32, %c0_i32_0 : i32, i32
  }
  func.func @transform_5(%arg0: i32) -> (i32, i32) {
    %c0_i32 = arith.constant 0 : i32
    %c0_i32_0 = arith.constant 0 : i32
    return %arg0, %c0_i32 : i32, i32
  }
}

</mosaic_0001>

<bundles_post_ra>
// kernel: tpu_custom_call.1
= control target key start
LH: loop header
LB: loop body
LE: loop exit
PB: predicated region body
PF: predicated region fallthrough
CT: control target
= control target key end

     0   :  { %v312_v1 = vmov 0.0   ;;  %vm39_vm0 = vcmask 130048   ;;  %vm313_vm1 = vmmov 0   ;;  %s396_s0 = inlined_call_operand.vmem [shape: f32[8,16], index: 0, kind: input, shape index: {}]   ;;  %s397_s1 = inlined_call_operand.vmem [shape: bf16[16,128], index: 1, kind: input, shape index: {}]   ;;  %s398_s2 = inlined_call_operand.vmem [shape: f32[1,128], index: 2, kind: input, shape index: {}]   ;;  %s399_s3 = inlined_call_operand.vmem [shape: bf16[128,8], index: 3, kind: input, shape index: {}]   ;;  %s400_s4 = inlined_call_operand.vmem [shape: f32[1,8], index: 4, kind: input, shape index: {}]   ;;  %s401_s5 = inlined_call_operand.hbm [shape: f32[8,8], index: 5, kind: output, shape index: {}]  }
   0x1   :  { %v275_v0 = vld [vmem:[%s397_s1] sm:$0xff]   ;;  %246 = vmatprep.subr.bf16.mxu0 %v312_v1  ;;  %252 = vmatprep.subr.bf16.mxu1 %v312_v1  ;;  %v277_v5 = vld [vmem:[%s399_s3 + $0x8] sm:$0xff]   ;;  %v278_v6 = vld [vmem:[%s399_s3 + $0x10] sm:$0xff]  }
   0x2   :  { %v22_v2 = vld [vmem:[%s396_s0] sm:$0xff]  ;;  %247 = vmatpush3.bf16.msra.mxu0 %v275_v0  ;;  %248 = vmatprep.mubr.msk.bf16.mxu0 %vm313_vm1, %v312_v1 }
   0x3   :  { %v276_v3 = vld [vmem:[%s399_s3] sm:$0xff]   ;;  %v23_v4 = vpack.c.bf16 %v22_v2, %v22_v2  ;;  %268 = vmatprep.mubr.msk.bf16.mxu1 %vm313_vm1, %v312_v1 }
   0x4   :  { %253 = vmatpush3.bf16.msra.mxu1 %v276_v3 }
   0x5   :  { %254 = vmatprep.subr.bf16.mxu1 %v312_v1  ;;  %249 = vmatmul.mubr.msk.bf16.vlgmr.msra.gmra.mrb[0].mxu0 %vm39_vm0, %v23_v4 }
   0x8   :  { %255 = vmatpush3.bf16.msra.mxu1 %v277_v5 }
   0x9   :  { %256 = vmatprep.subr.bf16.mxu1 %v312_v1 }
   0xa   :  { %10 = vsyncpa [#allocation3], 0  ;;  %v279_v7 = vld [vmem:[%s399_s3 + $0x18] sm:$0xff]   ;;  %v280_v8 = vld [vmem:[%s399_s3 + $0x20] sm:$0xff]   ;;  %vm196_vm2 = vcmask 64512  }
   0xb   :  { %v281_v9 = vld [vmem:[%s399_s3 + $0x28] sm:$0xff]   ;;  %v282_v10 = vld [vmem:[%s399_s3 + $0x30] sm:$0xff]   ;;  %v283_v11 = vld [vmem:[%s399_s3 + $0x38] sm:$0xff]  }
   0xc   :  { %257 = vmatpush3.bf16.msra.mxu1 %v278_v6  ;;  %v223_v12 = vld [vmem:[%s398_s2] ss:$0 sm:$0xff]  ;;  %s314_s2 = smov [#allocation2]  }
   0xd   :  { %258 = vmatprep.subr.bf16.mxu1 %v312_v1  ;;  %v226_v20 = vld [vmem:[%s400_s4] ss:$0 sm:$0xff]  ;;  %s215_s3 = sshll.u32 %s314_s2, 4  ;;  %s216_s3 = int_to_ptr.vmem [resolvable:$true] %s215_s3 }
   0xe   :  { %s288_s4 = scalar_lea.vmem %s216_s3, 128  ;;  %p293_p1 = scmp.lt.s32.totalorder %s216_s3, %s216_s3 }
   0xf   :  { %p289_p0 = scmp.ne.s32.totalorder %s216_s3, %s288_s4  ;;  %p294_p2 = scmp.lt.s32.totalorder %s288_s4, %s288_s4 }
  0x10   :  { %259 = vmatpush3.bf16.msra.mxu1 %v279_v7 }
  0x11   :  { %260 = vmatprep.subr.bf16.mxu1 %v312_v1  ;;  %p295_p3 = por %p294_p2, %p293_p1 }
  0x13   :  { %p296_p4 = pnand %p295_p3, %p289_p0 }
  0x14   :  { %261 = vmatpush3.bf16.msra.mxu1 %v280_v8 }
  0x15   :  { %262 = vmatprep.subr.bf16.mxu1 %v312_v1 }
  0x18   :  { %263 = vmatpush3.bf16.msra.mxu1 %v281_v9 }
  0x19   :  { %264 = vmatprep.subr.bf16.mxu1 %v312_v1 }
  0x1c   :  { %265 = vmatpush3.bf16.msra.mxu1 %v282_v10 }
  0x1d   :  { %266 = vmatprep.subr.bf16.mxu1 %v312_v1 }
  0x20   :  { %267 = vmatpush3.bf16.msra.mxu1 %v283_v11 }
  0xd8   :  { %v77_v13 = vpop.f32.mrb[0].mxu0 }
  0xd9   :  { %v78_v14 = vadd.f32 %v223_v12, %v77_v13  ;;  %v250_v15 = vpop.f32.mrb[1].mxu0 }
  0xda   :  { %v80_v16 = vpop.f32.mrb[2].mxu0 }
  0xdb   :  { %v83_v17 = vmax.f32 %v78_v14, 0.0  ;;  %v251_v18 = vpop.f32.mrb[3].mxu0 }
  0xdd   :  { %v84_v19 = vpack.c.bf16 %v83_v17, %v83_v17 }
  0xdf   :  { %269 = vmatmul.mubr.bf16.vlgmr.msra.gmra.mrb[0].mxu1 %v84_v19 }
 0x1b2   :  { %v190_v21 = vpop.f32.mrb[0].mxu1 }
 0x1b3   :  { %v191_v22 = vadd.f32 %v226_v20, %v190_v21  ;;  %v270_v23 = vpop.f32.mrb[1].mxu1 }
 0x1b4   :  { %v193_v24 = vpop.f32.mrb[2].mxu1 }
 0x1b5   :  { %v271_v25 = vpop.f32.mrb[3].mxu1  ;;  %v197_v26 = vsel %vm196_vm2, %v191_v22, -inf }
 0x1b6   :  { %198 = vmax.xlane.f32.xlu0 %v197_v26 }
 0x243   :  { %v199_v27 = vpop.xlane.xlu0 %198 }
 0x244   :  { %v200_v28 = vsub.f32 %v191_v22, %v199_v27 }
 0x246   :  { %v201_v29 = vmul.f32 1.442695, %v200_v28 }
 0x248   :  { %284 = vpow2.f32 %v201_v29 }
 0x252   :  { %v285_v30 = vpop.eup %284 }
 0x253   :  { %v203_v31 = vsel %vm196_vm2, %v285_v30, 0.0 }
 0x254   :  { %204 = vadd.xlane.f32.xlu0 %v203_v31 }
 0x2e1   :  { %v205_v32 = vpop.xlane.xlu0 %204 }
 0x2e2   :  { %286 = vrcp.f32 %v205_v32 }
 0x2ec   :  { %v287_v33 = vpop.eup %286 }
 0x2ed   :  { %v207_v34 = vmul.f32 %v287_v33, %v285_v30 }
 0x2ef   :  { %208 = vst.msk [vmem:[#allocation2] sm:$0xff] %vm196_vm2, %v207_v34 }
 0x2f0   :  { %299 = shalt.err (!%p296_p4)
}
 0x2f1   :  { %s300_s17 = scalar_lea.hbm %s401_s5, 128 }
 0x2f2   :  { %p301_p5 = scmp.ne.s32.totalorder %s401_s5, %s300_s17  ;;  %p304_p6 = scmp.lt.u32.totalorder %s300_s17, %s401_s5 }
 0x2f4   :  { %p306_p7 = pnand %p304_p6, %p301_p5 }
 0x2f6   :  { %309 = shalt.err (!%p306_p7)
}
 0x2f7   :  { %218 = dma.vmem_to_hbm [thread:$0]  %s216_s3, 128, %s401_s5, [#allocation3]  }
 0x2f8   :  { %310 = dma.done.wait [#allocation3], 128  }
 0x2f9   :  { %311 = vsyncadd [#allocation3], 4294967168 }
 0x2fa   :  { %222 = vsyncpa [#allocation3], 1 }

</bundles_post_ra>
